<compile_context>
chip_gen: v7x
topology: tpu7x:2x2x1
jax: 0.10.0
libtpu: 0.0.40
codegen_flags: <defaults>
</compile_context>

<pallas_src>
import math

import jax
import jax.numpy as jnp
import numpy as np
from jax.experimental import pallas as pl
from jax.experimental.pallas import tpu as pltpu


# ---------------------------------------------------------------------------
# Host-side (static) construction of the Gaussian taps and resampling matrices
# ---------------------------------------------------------------------------
def _gaussian_1d(scale):
    """Matches AntiAliasInterpolation2d.__init__ (1-D factor of the 2-D kernel)."""
    sigma = (1.0 / scale - 1.0) / 2.0
    ksize = 2 * round(sigma * 4) + 1
    ka = ksize // 2
    kb = ka - 1 if ksize % 2 == 0 else ka
    xs = np.arange(ksize, dtype=np.float64)
    mean = (ksize - 1) / 2.0
    g = np.exp(-((xs - mean) ** 2) / (2.0 * sigma ** 2))
    g = g / g.sum()  # (g/sum) outer (g/sum) == 2-D kernel / 2-D sum
    return g.astype(np.float32), ksize, ka, kb


def _nearest_src_indices(in_size, out_size, scale):
    """PyTorch F.interpolate(mode='nearest', scale_factor=scale) source index rule:
    src = min(floor(dst * (1/scale)), in_size - 1).
    # TODO(synk): under recompute_scale_factor=True PyTorch uses floor(dst*in/out),
    # which can differ by one source row/col when in*scale is non-integral.
    """
    src = np.floor(np.arange(out_size, dtype=np.float64) * (1.0 / scale)).astype(np.int64)
    return np.minimum(src, in_size - 1)


def _resample_matrix(in_size, out_size, g, ka, scale):
    """(out_size, in_size) matrix M with M[o, i] = g[i - src[o] + ka] (0 if OOB).

    Encodes: zero-pad by (ka, kb), 'valid' Gaussian conv, then nearest downsample.
    """
    K = g.shape[0]
    src = _nearest_src_indices(in_size, out_size, scale)
    mat = np.zeros((out_size, in_size), dtype=np.float32)
    for o in range(out_size):
        lo = int(src[o]) - ka
        for j in range(K):
            i = lo + j
            if 0 <= i < in_size:
                mat[o, i] = g[j]
    return mat


# ---------------------------------------------------------------------------
# Pallas kernel: B (n, c) slices per grid step -> 2*B MXU matmuls
# ---------------------------------------------------------------------------
def _aa_interp_kernel(x_ref, rh_ref, rw_ref, o_ref):
    # x_ref : (B, H, W)      native-dtype input slices
    # rh_ref: (Hout, H)      row taps (blur-H + nearest-subsample-H)
    # rw_ref: (W, Wout)      col taps (blur-W + nearest-subsample-W)
    # o_ref : (B, Hout, Wout)
    rh = rh_ref[...]
    rw = rw_ref[...]
    for b in range(x_ref.shape[0]):  # static unroll over the per-step batch
        # (Hout, H) @ (H, W): lane-dense (N = W), f32 MXU accumulation.
        t = jnp.dot(rh, x_ref[b], preferred_element_type=jnp.float32)
        # (Hout, W) @ (W, Wout): final output tile for slice b.
        o_ref[b] = jnp.dot(t.astype(rw.dtype), rw,
                           preferred_element_type=jnp.float32).astype(o_ref.dtype)


def _pick_block_batch(nc, h, w, hout, wout, itemsize, vmem_budget=24 << 20, max_b=32):
    """Largest per-step batch B (divisor of nc) keeping double-buffered blocks
    within a VMEM budget that is safe on v7x (64 MiB physical)."""
    per_slice = 2 * (h * w + hout * wout) * itemsize + hout * w * 4
    cap = max(1, min(max_b, int(vmem_budget // max(per_slice, 1)), nc))
    best = 1
    for d in range(1, cap + 1):
        if nc % d == 0:
            best = d
    if best == nc and nc >= 2:
        # Prefer >= 2 grid steps so v7x can spread the parallel axis over both TCs.
        best = max(d for d in range(1, nc // 2 + 1) if nc % d == 0)
    return best


def anti_alias_interpolation2d(x_nchw, scale):
    """x_nchw: (N, C, H, W) float32 or bfloat16.
    Returns (N, C, floor(H*scale), floor(W*scale)) in the input dtype."""
    if scale == 1.0:
        return x_nchw
    assert 0.0 < scale < 1.0, "AntiAliasInterpolation2d kernel expects 0 < scale <= 1"

    N, C, H, W = x_nchw.shape
    g, _ksize, ka, _kb = _gaussian_1d(scale)
    Hout = int(math.floor(H * scale))
    Wout = int(math.floor(W * scale))

    dtype = x_nchw.dtype
    tap_dtype = jnp.bfloat16 if dtype == jnp.bfloat16 else jnp.float32
    rh = jnp.asarray(_resample_matrix(H, Hout, g, ka, scale), dtype=tap_dtype)  # (Hout, H)
    rw = jnp.asarray(np.ascontiguousarray(_resample_matrix(W, Wout, g, ka, scale).T),
                     dtype=tap_dtype)                                           # (W, Wout)

    NC = N * C
    itemsize = jnp.dtype(dtype).itemsize
    B = _pick_block_batch(NC, H, W, Hout, Wout, itemsize)
    grid = (NC // B,)

    # Free, contiguous reshape (no HBM copy, no dtype cast): fold (N, C) into grid axis.
    x_flat = x_nchw.reshape(NC, H, W)

    tap_bytes = (Hout * H + W * Wout) * jnp.dtype(tap_dtype).itemsize
    vmem_needed = (2 * B * (H * W + Hout * Wout) * itemsize   # double-buffered in/out blocks
                   + 2 * tap_bytes                            # RH/RW (2 buffers each)
                   + 4 * Hout * max(W, Wout) * 4)             # f32 intermediates headroom
    vmem_limit = int(min(max(vmem_needed + (4 << 20), 16 << 20), 64 << 20))

    flops = 2 * NC * (Hout * H * W + Hout * W * Wout)
    bytes_accessed = NC * (H * W + Hout * Wout) * itemsize + tap_bytes

    out_flat = pl.pallas_call(
        _aa_interp_kernel,
        out_shape=jax.ShapeDtypeStruct((NC, Hout, Wout), dtype),
        grid=grid,
        in_specs=[
            pl.BlockSpec((B, H, W), lambda i: (i, 0, 0)),
            pl.BlockSpec((Hout, H), lambda i: (0, 0)),
            pl.BlockSpec((W, Wout), lambda i: (0, 0)),
        ],
        out_specs=pl.BlockSpec((B, Hout, Wout), lambda i: (i, 0, 0)),
        compiler_params=pltpu.CompilerParams(
            dimension_semantics=("parallel",),
            vmem_limit_bytes=vmem_limit,
        ),
        cost_estimate=pl.CostEstimate(
            flops=flops, transcendentals=0, bytes_accessed=bytes_accessed),
    )(x_flat, rh, rw)

    # Free reshape back to NCHW; no transpose / extra HBM traffic.
    return out_flat.reshape(N, C, Hout, Wout)


# ---------------------------------------------------------------------------
# Pure-JAX reference mirroring the PyTorch module ops exactly
# ---------------------------------------------------------------------------
def anti_alias_reference(x_nchw, scale):
    if scale == 1.0:
        return x_nchw
    N, C, H, W = x_nchw.shape
    g, _ksize, ka, kb = _gaussian_1d(scale)
    kern2d = jnp.asarray(np.outer(g, g), dtype=jnp.float32)
    w = jnp.tile(kern2d[None, None], (C, 1, 1, 1))                     # (C,1,K,K)
    xp = jnp.pad(x_nchw.astype(jnp.float32), ((0, 0), (0, 0), (ka, kb), (ka, kb)))
    blur = jax.lax.conv_general_dilated(
        xp, w, window_strides=(1, 1), padding="VALID",
        dimension_numbers=("NCHW", "OIHW", "NCHW"),
        feature_group_count=C,
    )
    Hout = int(math.floor(H * scale))
    Wout = int(math.floor(W * scale))
    ih = jnp.asarray(_nearest_src_indices(H, Hout, scale))
    iw = jnp.asarray(_nearest_src_indices(W, Wout, scale))
    return blur[:, :, ih][:, :, :, iw].astype(x_nchw.dtype)


if __name__ == "__main__":
    # Small shapes consistent with the module: N=2, C=4, 16x16 spatial.
    N, C, H, W = 2, 4, 16, 16
    key = jax.random.PRNGKey(0)

    # f32 path, two different scales (different Gaussian kernel sizes).
    for scale in (0.25, 0.5):
        key, sub = jax.random.split(key)
        x = jax.random.normal(sub, (N, C, H, W), dtype=jnp.float32)
        out = jax.block_until_ready(anti_alias_interpolation2d(x, scale))
        ref = anti_alias_reference(x, scale)
        Hout, Wout = int(math.floor(H * scale)), int(math.floor(W * scale))
        assert out.shape == (N, C, Hout, Wout), out.shape
        err = float(jnp.max(jnp.abs(out.astype(jnp.float32) - ref.astype(jnp.float32))))
        assert err < 1e-4, (scale, err)

    # bf16 native-dtype path (halved HBM bytes; f32 MXU accumulation), loose tol.
    key, sub = jax.random.split(key)
    xb = jax.random.normal(sub, (N, C, H, W), dtype=jnp.float32).astype(jnp.bfloat16)
    outb = jax.block_until_ready(anti_alias_interpolation2d(xb, 0.25))
    refb = anti_alias_reference(xb, 0.25)
    errb = float(jnp.max(jnp.abs(outb.astype(jnp.float32) - refb.astype(jnp.float32))))
    assert errb < 1e-1, errb

    print("KERNEL_OK")
</pallas_src>

<mosaic_0001>
module attributes {stable_mosaic.version = 11 : i64} {
  func.func @_aa_interp_kernel(%arg0: i32, %arg1: memref<4x16x16xf32, #tpu.memory_space<vmem>>, %arg2: memref<4x16xf32, #tpu.memory_space<vmem>>, %arg3: memref<16x4xf32, #tpu.memory_space<vmem>>, %arg4: memref<4x4x4xf32, #tpu.memory_space<vmem>>) attributes {dimension_semantics = [#tpu.dimension_semantics<parallel>], iteration_bounds = array<i64: 2>, scalar_prefetch = 0 : i64, scratch_operands = 0 : i64, tpu.core_type = #tpu.core_type<tc>, window_params = [{transform_indices = @transform_0, window_bounds = array<i64: 4, 16, 16>}, {pipeline_mode = #tpu.pipeline_mode<synchronous>, transform_indices = @transform_1, window_bounds = array<i64: 4, 16>}, {pipeline_mode = #tpu.pipeline_mode<synchronous>, transform_indices = @transform_2, window_bounds = array<i64: 16, 4>}, {transform_indices = @transform_3, window_bounds = array<i64: 4, 4, 4>}]} {
    %c0 = arith.constant 0 : index
    %c0_0 = arith.constant 0 : index
    %0 = vector.load %arg2[%c0, %c0_0] : memref<4x16xf32, #tpu.memory_space<vmem>>, vector<4x16xf32>
    %c0_1 = arith.constant 0 : index
    %c0_2 = arith.constant 0 : index
    %1 = vector.load %arg3[%c0_1, %c0_2] : memref<16x4xf32, #tpu.memory_space<vmem>>, vector<16x4xf32>
    %c0_3 = arith.constant 0 : index
    %c0_4 = arith.constant 0 : index
    %c0_5 = arith.constant 0 : index
    %2 = vector.load %arg1[%c0_3, %c0_4, %c0_5] : memref<4x16x16xf32, #tpu.memory_space<vmem>>, vector<1x16x16xf32>
    %3 = vector.shape_cast %2 : vector<1x16x16xf32> to vector<16x16xf32>
    %cst = arith.constant dense<0.000000e+00> : vector<4x16xf32>
    %4 = tpu.matmul %0, %3, %cst {dimension_numbers = #tpu.dot_dimension_numbers<[1], [0], [0], [1], [0, 0, 1, 1], [], []>} : vector<4x16xf32>, vector<16x16xf32>, vector<4x16xf32> -> vector<4x16xf32>
    %cst_6 = arith.constant dense<0.000000e+00> : vector<4x4xf32>
    %5 = tpu.matmul %4, %1, %cst_6 {dimension_numbers = #tpu.dot_dimension_numbers<[1], [0], [0], [1], [0, 0, 1, 1], [], []>} : vector<4x16xf32>, vector<16x4xf32>, vector<4x4xf32> -> vector<4x4xf32>
    %c0_7 = arith.constant 0 : index
    %c0_8 = arith.constant 0 : index
    %c0_9 = arith.constant 0 : index
    %6 = vector.load %arg4[%c0_7, %c0_8, %c0_9] : memref<4x4x4xf32, #tpu.memory_space<vmem>>, vector<1x4x4xf32>
    %7 = vector.shape_cast %6 : vector<1x4x4xf32> to vector<4x4xf32>
    %8 = vector.shape_cast %5 : vector<4x4xf32> to vector<1x4x4xf32>
    tpu.vector_store %arg4[%c0_7, %c0_8, %c0_9], %8 {strides = array<i32>} : memref<4x4x4xf32, #tpu.memory_space<vmem>>, vector<1x4x4xf32>,
    %c1 = arith.constant 1 : index
    %c0_10 = arith.constant 0 : index
    %c0_11 = arith.constant 0 : index
    %9 = vector.load %arg1[%c1, %c0_10, %c0_11] : memref<4x16x16xf32, #tpu.memory_space<vmem>>, vector<1x16x16xf32>
    %10 = vector.shape_cast %9 : vector<1x16x16xf32> to vector<16x16xf32>
    %cst_12 = arith.constant dense<0.000000e+00> : vector<4x16xf32>
    %11 = tpu.matmul %0, %10, %cst_12 {dimension_numbers = #tpu.dot_dimension_numbers<[1], [0], [0], [1], [0, 0, 1, 1], [], []>} : vector<4x16xf32>, vector<16x16xf32>, vector<4x16xf32> -> vector<4x16xf32>
    %cst_13 = arith.constant dense<0.000000e+00> : vector<4x4xf32>
    %12 = tpu.matmul %11, %1, %cst_13 {dimension_numbers = #tpu.dot_dimension_numbers<[1], [0], [0], [1], [0, 0, 1, 1], [], []>} : vector<4x16xf32>, vector<16x4xf32>, vector<4x4xf32> -> vector<4x4xf32>
    %c1_14 = arith.constant 1 : index
    %c0_15 = arith.constant 0 : index
    %c0_16 = arith.constant 0 : index
    %13 = vector.load %arg4[%c1_14, %c0_15, %c0_16] : memref<4x4x4xf32, #tpu.memory_space<vmem>>, vector<1x4x4xf32>
    %14 = vector.shape_cast %13 : vector<1x4x4xf32> to vector<4x4xf32>
    %15 = vector.shape_cast %12 : vector<4x4xf32> to vector<1x4x4xf32>
    tpu.vector_store %arg4[%c1_14, %c0_15, %c0_16], %15 {strides = array<i32>} : memref<4x4x4xf32, #tpu.memory_space<vmem>>, vector<1x4x4xf32>,
    %c2 = arith.constant 2 : index
    %c0_17 = arith.constant 0 : index
    %c0_18 = arith.constant 0 : index
    %16 = vector.load %arg1[%c2, %c0_17, %c0_18] : memref<4x16x16xf32, #tpu.memory_space<vmem>>, vector<1x16x16xf32>
    %17 = vector.shape_cast %16 : vector<1x16x16xf32> to vector<16x16xf32>
    %cst_19 = arith.constant dense<0.000000e+00> : vector<4x16xf32>
    %18 = tpu.matmul %0, %17, %cst_19 {dimension_numbers = #tpu.dot_dimension_numbers<[1], [0], [0], [1], [0, 0, 1, 1], [], []>} : vector<4x16xf32>, vector<16x16xf32>, vector<4x16xf32> -> vector<4x16xf32>
    %cst_20 = arith.constant dense<0.000000e+00> : vector<4x4xf32>
    %19 = tpu.matmul %18, %1, %cst_20 {dimension_numbers = #tpu.dot_dimension_numbers<[1], [0], [0], [1], [0, 0, 1, 1], [], []>} : vector<4x16xf32>, vector<16x4xf32>, vector<4x4xf32> -> vector<4x4xf32>
    %c2_21 = arith.constant 2 : index
    %c0_22 = arith.constant 0 : index
    %c0_23 = arith.constant 0 : index
    %20 = vector.load %arg4[%c2_21, %c0_22, %c0_23] : memref<4x4x4xf32, #tpu.memory_space<vmem>>, vector<1x4x4xf32>
    %21 = vector.shape_cast %20 : vector<1x4x4xf32> to vector<4x4xf32>
    %22 = vector.shape_cast %19 : vector<4x4xf32> to vector<1x4x4xf32>
    tpu.vector_store %arg4[%c2_21, %c0_22, %c0_23], %22 {strides = array<i32>} : memref<4x4x4xf32, #tpu.memory_space<vmem>>, vector<1x4x4xf32>,
    %c3 = arith.constant 3 : index
    %c0_24 = arith.constant 0 : index
    %c0_25 = arith.constant 0 : index
    %23 = vector.load %arg1[%c3, %c0_24, %c0_25] : memref<4x16x16xf32, #tpu.memory_space<vmem>>, vector<1x16x16xf32>
    %24 = vector.shape_cast %23 : vector<1x16x16xf32> to vector<16x16xf32>
    %cst_26 = arith.constant dense<0.000000e+00> : vector<4x16xf32>
    %25 = tpu.matmul %0, %24, %cst_26 {dimension_numbers = #tpu.dot_dimension_numbers<[1], [0], [0], [1], [0, 0, 1, 1], [], []>} : vector<4x16xf32>, vector<16x16xf32>, vector<4x16xf32> -> vector<4x16xf32>
    %cst_27 = arith.constant dense<0.000000e+00> : vector<4x4xf32>
    %26 = tpu.matmul %25, %1, %cst_27 {dimension_numbers = #tpu.dot_dimension_numbers<[1], [0], [0], [1], [0, 0, 1, 1], [], []>} : vector<4x16xf32>, vector<16x4xf32>, vector<4x4xf32> -> vector<4x4xf32>
    %c3_28 = arith.constant 3 : index
    %c0_29 = arith.constant 0 : index
    %c0_30 = arith.constant 0 : index
    %27 = vector.load %arg4[%c3_28, %c0_29, %c0_30] : memref<4x4x4xf32, #tpu.memory_space<vmem>>, vector<1x4x4xf32>
    %28 = vector.shape_cast %27 : vector<1x4x4xf32> to vector<4x4xf32>
    %29 = vector.shape_cast %26 : vector<4x4xf32> to vector<1x4x4xf32>
    tpu.vector_store %arg4[%c3_28, %c0_29, %c0_30], %29 {strides = array<i32>} : memref<4x4x4xf32, #tpu.memory_space<vmem>>, vector<1x4x4xf32>,
    return
  }
  func.func @transform_0(%arg0: i32) -> (i32, i32, i32) {
    %c0_i32 = arith.constant 0 : i32
    %c0_i32_0 = arith.constant 0 : i32
    %c0_i32_1 = arith.constant 0 : i32
    return %arg0, %c0_i32, %c0_i32_0 : i32, i32, i32
  }
  func.func @transform_1(%arg0: i32) -> (i32, i32) {
    %c0_i32 = arith.constant 0 : i32
    %c0_i32_0 = arith.constant 0 : i32
    %c0_i32_1 = arith.constant 0 : i32
    return %c0_i32, %c0_i32_0 : i32, i32
  }
  func.func @transform_2(%arg0: i32) -> (i32, i32) {
    %c0_i32 = arith.constant 0 : i32
    %c0_i32_0 = arith.constant 0 : i32
    %c0_i32_1 = arith.constant 0 : i32
    return %c0_i32, %c0_i32_0 : i32, i32
  }
  func.func @transform_3(%arg0: i32) -> (i32, i32, i32) {
    %c0_i32 = arith.constant 0 : i32
    %c0_i32_0 = arith.constant 0 : i32
    %c0_i32_1 = arith.constant 0 : i32
    return %arg0, %c0_i32, %c0_i32_0 : i32, i32, i32
  }
}

</mosaic_0001>

<bundles_post_ra>
// kernel: tpu_custom_call.1
= control target key start
LH: loop header
LB: loop body
LE: loop exit
PB: predicated region body
PF: predicated region fallthrough
CT: control target
= control target key end

     0   :  { %8 = vsyncpa [#allocation3], 0  ;;  %s1274_s0 = inlined_call_operand.hbm [shape: f32[8,16,16], index: 0, kind: input, shape index: {}]   ;;  %s1275_s1 = inlined_call_operand.vmem [shape: f32[4,16], index: 1, kind: input, shape index: {}]   ;;  %s1276_s2 = inlined_call_operand.vmem [shape: f32[16,4], index: 2, kind: input, shape index: {}]   ;;  %s1277_s3 = inlined_call_operand.vmem [shape: f32[8,4,4], index: 3, kind: output, shape index: {}]  }
   0x1   :  { %10 = vsyncpa [#allocation3 + $0x1], 0  ;;  %s1132_s12 = smov 0   ;;  %s1134_s13 = smov 0  }
   0x2   :  { %s1136_s14 = smov 0   ;;  %s1138_s15 = smov 0  }
   0x3 LB: > { %s859_s16 = sadd.s32 4294967295, %s1104_s15   ;;  %s1152_s17 = sadd.s32 1, %s1104_s15   ;;  %s1104_s15 = sphi %s1138_s15, %s1284_s15   ;;  %s1100_s14 = sphi %s1136_s14, %s1283_s14   ;;  %s1096_s13 = sphi %s1134_s13, %s1282_s13   ;;  %s1092_s12 = sphi %s1132_s12, %s1281_s12  }
   0x4   : > { %s20_s18 = ssub.s32 %s1104_s15, %s1152_s17  ;;  %s23_s19 = sadd.s32 1, %s1100_s14 }
   0x5   : > { %p21_p0 = scmp.eq.s32.totalorder %s20_s18, 0  ;;  %p30_p1 = scmp.ne.s32.totalorder %s1100_s14, %s1096_s13 }
   0x6   : > { %p31_p2 = scmp.eq.s32.totalorder %s1104_s15, 0  ;;  %p36_p3 = scmp.ne.s32.totalorder %s1096_s13, %s1092_s12 }
   0x7   : > { %s1162_s20 = scalar_select %p21_p0, %s1100_s14, %s23_s19  }
   0x8   : > { %p32_p4 = por %p31_p2, %p30_p1  ;;  %p37_p5 = scmp.eq.s32.totalorder %s859_s16, 0 }
   0x9   : > { %p1002_p6 = scmp.lt.s32.totalorder %s1104_s15, 2  ;;  %s134_s22 = sand.u32 1, %s1100_s14  }
   0xa   : > { %p1167_p7 = por %p37_p5, %p36_p3  ;;  %s863_s23 = sshll.u32 %s134_s22, 6 }
   0xb   : > { %s891_s24 = sshll.u32 %s1104_s15, 10  ;;  %s138_s28 = scalar_lea.vmem [#allocation2], %s863_s23 }
   0xc   : > { %s1176_s27 = scalar_lea.hbm %s1274_s0, %s891_s24  ;;  %s146_s29 = sshll.u32 %s138_s28, 4  ;;  %s1178_s29 = int_to_ptr.vmem [resolvable:$true] %s146_s29 }
   0xd   : > { %p1180_p8 = pnand %p1002_p6, %p32_p4  ;;  %s1185_s4 = scalar_lea.sflag [#allocation3], %s134_s22 }
   0xe   : > { %s1040_s5 = scalar_lea.hbm %s1176_s27, 1024  ;;  %s1045_s8 = scalar_lea.hbm %s1274_s0, 2048 }
   0xf   : > { %p1041_p10 = scmp.ne.s32.totalorder %s1176_s27, %s1040_s5  ;;  %p1042_p11 = pneg %p1180_p8 }
  0x10   : > { %p1046_p0 = scmp.lt.u32.totalorder %s1176_s27, %s1274_s0  ;;  %p1047_p1 = scmp.lt.u32.totalorder %s1045_s8, %s1040_s5 }
  0x11   : > { %p1043_p12 = pnand %p1042_p11, %p1041_p10  ;;  %p1049_p3 = scmp.lt.u32.totalorder %s1040_s5, %s1176_s27 }
  0x12   : > { %p1048_p2 = por %p1047_p1, %p1046_p0 }
  0x13   : > { %p1044_p13 = pneg %p1043_p12 }
  0x14   : > { %p1050_p4 = por %p1049_p3, %p1048_p2 }
  0x16   : > { %p1051_p5 = pnand %p1050_p4, %p1044_p13 }
  0x18   : > { %1054 = shalt.err (!%p1051_p5)
}
  0x19   : > { %s1055_s11 = scalar_lea.vmem %s1178_s29, 1024  ;;  %s1106_s12 = smov [#allocation2]  }
  0x1a   : > { %p1056_p6 = scmp.ne.s32.totalorder %s1178_s29, %s1055_s11  ;;  %s1060_s18 = sshll.u32 %s1106_s12, 4  ;;  %s1061_s18 = int_to_ptr.vmem [resolvable:$false] %s1060_s18 }
  0x1b   : > { %s1062_s19 = scalar_lea.vmem %s1061_s18, 2048  ;;  %p1063_p9 = scmp.lt.s32.totalorder %s1178_s29, %s1061_s18 }
  0x1c   : > { %p1058_p10 = pnand %p1056_p6, %p1042_p11  ;;  %p1064_p0 = scmp.lt.s32.totalorder %s1062_s19, %s1055_s11 }
  0x1e   : > { %p1059_p12 = pneg %p1058_p10  ;;  %p1065_p1 = por %p1064_p0, %p1063_p9 }
  0x20   : > { %p1066_p2 = pnand %p1065_p1, %p1059_p12 }
  0x22   : > { %1069 = shalt.err (!%p1066_p2)
}
  0x23   : > { %s1107_s22 = smov 128   ;;  %s1108_s23 = smov 8  }
  0x24   : > { %1001 = dma.hbm_to_vmem [thread:$0]  (!%p1180_p8), %s1176_s27, 1024, %s1178_s29, %s1185_s4, %s1107_s22, %s1107_s22, %s1108_s23  }
  0x25   : > { %p154_p11 = scmp.lt.s32.totalorder %s1104_s15, 3  ;;  %p1280_p13 = scmp.ge.s32.totalorder %s1104_s15, 1 }
  0x27   : > { %p155_p3 = pnand %p1280_p13, %p154_p11 }
  0x28   : > { %s160_s24 = sand.u32 (!%p155_p3), 1, %s1096_s13  }
  0x29   : > { %158 = sbr.rel (%p155_p3) target bundleno = 492 (0x1ec), region = 32  ;;  %s868_s25 = sshll.u32 (!%p155_p3), %s160_s24, 6 }
  0x2a   : > { %s161_s26 = scalar_lea.sflag (!%p155_p3), [#allocation3], %s160_s24  ;;  %s1217_s28 = scalar_lea.vmem (!%p155_p3), [#allocation2], %s868_s25 }
  0x30   : > { %1087 = dma.done.wait (%p1167_p7), %s161_s26, 1024  }
  0x31   : > { %1089 = vsyncadd (%p1167_p7), %s161_s26, 4294966272  ;;  %v1109_v0 = vmov 0.0|0.0   ;;  %vm1110_vm0 = vmmov 0   ;;  %v1111_v1 = vmov 0.0   ;;  %v197_v2 = vld [vmem:[%s1217_s28] sm:$0xff]  ;;  %v198_v3 = vld [vmem:[%s1217_s28 + $0x8] sm:$0xff] }
  0x32   : > { %972 = vmatprep.subr.bf16.mxu0 %v1109_v0  ;;  %920 = vmatprep.mubr.msk.f32.mxu0 %vm1110_vm0, %v1111_v1  ;;  %v973_v4 = vpack.c.bf16 %v198_v3, %v197_v2  ;;  %v873_v5 = vld [vmem:[%s1217_s28 + $0x10] sm:$0xff]  ;;  %v874_v6 = vld [vmem:[%s1217_s28 + $0x18] sm:$0xff]  ;;  %v194_v7 = vld [vmem:[%s1275_s1] sm:$0xf]  ;;  %vm199_vm1 = vcmask 130048   ;;  %s869_s6 = sshll.u32 %s859_s16, 2 }
  0x33   : > { %975 = vmatprep.subr.bf16.mxu1 %v1109_v0  ;;  %927 = vmatprep.mubr.msk.f32.mxu1 %vm1110_vm0, %v1111_v1  ;;  %v979_v8 = vpack.c.bf16 %v874_v6, %v873_v5  ;;  %v195_v9 = vld [vmem:[%s1276_s2] sm:$0xff]  ;;  %v196_v10 = vld [vmem:[%s1276_s2 + $0x8] sm:$0xff]  ;;  %v883_v15 = vld [vmem:[%s1217_s28 + $0x30] sm:$0xff]  ;;  %p189_p7 = scmp.lt.s32.totalorder %s869_s6, 7  ;;  %vm346_vm2 = vcmask 27648  }
  0x34   : > { %974 = vmatpush3.bf16.msra.mxu0 %v973_v4  ;;  %v878_v11 = vld [vmem:[%s1217_s28 + $0x20] sm:$0xff]  ;;  %v879_v12 = vld [vmem:[%s1217_s28 + $0x28] sm:$0xff]  ;;  %v976_v13 = vpack.c.bf16 %v196_v10, %v195_v9  ;;  %v884_v16 = vld [vmem:[%s1217_s28 + $0x38] sm:$0xff] }
  0x35   : > { %978 = vmatprep.subr.bf16.mxu0 %v1109_v0  ;;  %v985_v14 = vpack.c.bf16 %v879_v12, %v878_v11  ;;  %v991_v17 = vpack.c.bf16 %v884_v16, %v883_v15  ;;  %s1286_s6 = smov (!%p189_p7, %s869_s6), 7 }
  0x36   : > { %977 = vmatpush3.bf16.msra.mxu1 %v976_v13  ;;  %s870_s7 = sshll.u32 %s1286_s6, 2 }
  0x37   : > { %921 = vmatmul.mubr.msk.f32.vlgmr.msra.gmra.mrb[0].mxu0 %vm199_vm1, %v194_v7  ;;  %981 = vmatprep.subr.bf16.mxu1 %v1109_v0  ;;  %s192_s10 = scalar_lea.vmem %s1277_s3, %s870_s7 }
  0x38   : > { %980 = vmatpush3.bf16.msra.mxu0 %v979_v8  ;;  %934 = vmatprep.mubr.msk.f32.mxu0 %vm1110_vm0, %v1111_v1 }
  0x39   : > { %984 = vmatprep.subr.bf16.mxu0 %v1109_v0 }
  0x3b   : > { %935 = vmatmul.mubr.msk.f32.vlgmr.msra.gmra.mrb[2].mxu0 %vm199_vm1, %v194_v7 }
  0x3c   : > { %986 = vmatpush3.bf16.msra.mxu0 %v985_v14  ;;  %948 = vmatprep.mubr.msk.f32.mxu0 %vm1110_vm0, %v1111_v1 }
  0x3d   : > { %990 = vmatprep.subr.bf16.mxu0 %v1109_v0 }
  0x3f   : > { %949 = vmatmul.mubr.msk.f32.vlgmr.msra.gmra.mrb[4].mxu0 %vm199_vm1, %v194_v7 }
  0x40   : > { %992 = vmatpush3.bf16.msra.mxu0 %v991_v17  ;;  %962 = vmatprep.mubr.msk.f32.mxu0 %vm1110_vm0, %v1111_v1 }
  0x43   : > { %963 = vmatmul.mubr.msk.f32.vlgmr.msra.gmra.mrb[6].mxu0 %vm199_vm1, %v194_v7 }
 0x10a   : > { %v269_v18 = vpop.f32.mrb[0].mxu0 }
 0x10b   : > { %v922_v19 = vpop.f32.mrb[1].mxu0  ;;  %928 = vmatmul.mubr.msk.f32.vlgmr.msra.gmra.mrb[0].mxu1 %vm199_vm1, %v269_v18 }
 0x10c   : > { %983 = vmatpush3.bf16.msra.mxu1 %v976_v13  ;;  %941 = vmatprep.mubr.msk.f32.mxu1 %vm1110_vm0, %v1111_v1 }
 0x10d   : > { %987 = vmatprep.subr.bf16.mxu1 %v1109_v0 }
 0x10e   : > { %v417_v20 = vpop.f32.mrb[2].mxu0 }
 0x10f   : > { %v936_v21 = vpop.f32.mrb[3].mxu0  ;;  %942 = vmatmul.mubr.msk.f32.vlgmr.msra.gmra.mrb[2].mxu1 %vm199_vm1, %v417_v20 }
 0x110   : > { %989 = vmatpush3.bf16.msra.mxu1 %v976_v13  ;;  %955 = vmatprep.mubr.msk.f32.mxu1 %vm1110_vm0, %v1111_v1 }
 0x111   : > { %993 = vmatprep.subr.bf16.mxu1 %v1109_v0 }
 0x112   : > { %v565_v22 = vpop.f32.mrb[4].mxu0 }
 0x113   : > { %v950_v23 = vpop.f32.mrb[5].mxu0  ;;  %956 = vmatmul.mubr.msk.f32.vlgmr.msra.gmra.mrb[4].mxu1 %vm199_vm1, %v565_v22 }
 0x114   : > { %995 = vmatpush3.bf16.msra.mxu1 %v976_v13  ;;  %969 = vmatprep.mubr.msk.f32.mxu1 %vm1110_vm0, %v1111_v1 }
 0x116   : > { %v713_v24 = vpop.f32.mrb[6].mxu0 }
 0x117   : > { %v964_v25 = vpop.f32.mrb[7].mxu0  ;;  %970 = vmatmul.mubr.msk.f32.vlgmr.msra.gmra.mrb[6].mxu1 %vm199_vm1, %v713_v24 }
 0x1de   : > { %v342_v26 = vpop.f32.mrb[0].mxu1 }
 0x1df   : > { %347 = vst.msk [vmem:[%s192_s10] sm:$0xf] %vm346_vm2, %v342_v26  ;;  %v929_v27 = vpop.f32.mrb[1].mxu1 }
 0x1e2   : > { %v490_v28 = vpop.f32.mrb[2].mxu1 }
 0x1e3   : > { %877 = vst.msk [vmem:[%s192_s10 + $0x4] sm:$0xf] %vm346_vm2, %v490_v28  ;;  %v943_v29 = vpop.f32.mrb[3].mxu1 }
 0x1e6   : > { %v638_v30 = vpop.f32.mrb[4].mxu1 }
 0x1e7   : > { %882 = vst.msk [vmem:[%s192_s10 + $0x8] sm:$0xf] %vm346_vm2, %v638_v30  ;;  %v957_v31 = vpop.f32.mrb[5].mxu1 }
 0x1ea   : > { %v786_v32 = vpop.f32.mrb[6].mxu1 }
 0x1eb   : > { %887 = vst.msk [vmem:[%s192_s10 + $0xc] sm:$0xf] %vm346_vm2, %v786_v32  ;;  %v971_v33 = vpop.f32.mrb[7].mxu1 }
 0x1ec PF: > { %p13_p8 = scmp.ge.s32.totalorder %s1152_s17, 4   ;;  %s1281_s12 = smov %s1096_s13 }
 0x1ed   : > { %s1282_s13 = smov %s1100_s14  ;;  %s1283_s14 = smov %s1162_s20 }
 0x1ee   : > { %s1284_s15 = smov %s1152_s17  ;;  %15 = sbr.rel (!%p13_p8) target bundleno = 3 (0x3), region = 78 }
 0x1f5   :  { %814 = vsyncpa [#allocation3], 1 }
 0x1f6   :  { %816 = vsyncpa [#allocation3 + $0x1], 1 }

</bundles_post_ra>
